<compile_context>
chip_gen: v5e
topology: v5e:2x2
jax: 0.10.0
libtpu: 0.0.40
codegen_flags: <defaults>
</compile_context>

<pallas_src>
import math

import jax
import jax.numpy as jnp
from jax.experimental import pallas as pl
from jax.experimental.pallas import tpu as pltpu


def _dense_kernel(x_ref, w_ref, o_ref):
    # x_ref: [TM, Kp]   w_ref: [Kp, Np]   o_ref: [TM, Np]
    y = jnp.dot(x_ref[...], w_ref[...], preferred_element_type=jnp.float32)
    o_ref[...] = y.astype(o_ref.dtype)


def _round_up(a, b):
    return (a + b - 1) // b * b


def multi_head_dense(x, weight, *, tm=512, cast_to_bf16=False):
    """y = x @ weight.T, matching F.linear(x, weight) with weight (in_ch, out_ch)."""
    *lead, feat = x.shape
    in_ch, out_ch = weight.shape
    assert feat == out_ch, "last dim of x must equal out_ch (F.linear semantics)"

    m = math.prod(lead) if lead else 1
    out_dtype = x.dtype

    x2 = x.reshape(m, out_ch)
    wt = weight.T  # [K, N] = [out_ch, in_ch]

    if cast_to_bf16:
        # Halves HBM/VMEM traffic on v6e/v7x; accumulator stays f32 in-kernel.
        x2 = x2.astype(jnp.bfloat16)
        wt = wt.astype(jnp.bfloat16)

    # Pad contraction (K) and output (N) dims to lane width so loads/stores are
    # lane-dense and the MXU sees a reasonable depth. Zero padding is exact.
    k_pad = _round_up(out_ch, 128)
    n_pad = _round_up(in_ch, 128)

    # Row-tile size: multiple of 8, no bigger than the (8-rounded) problem, and
    # capped so double-buffered x/out tiles + resident weight stay well under
    # the smallest scoped-VMEM default (v5e 16 MiB, v7x physical 64 MiB).
    bytes_per = jnp.dtype(x2.dtype).itemsize
    tm = max(8, min(tm, _round_up(m, 8)))
    vmem_budget = 12 * 1024 * 1024
    while tm > 8 and (2 * tm * (k_pad + n_pad) + k_pad * n_pad) * bytes_per > vmem_budget:
        tm //= 2
    tm = max(8, (tm // 8) * 8)

    m_pad = _round_up(m, tm)

    x2 = jnp.pad(x2, ((0, m_pad - m), (0, k_pad - out_ch)))
    wt = jnp.pad(wt, ((0, k_pad - out_ch), (0, n_pad - in_ch)))

    grid = (m_pad // tm,)

    flops = 2 * m_pad * k_pad * n_pad
    bytes_accessed = (
        m_pad * k_pad * bytes_per            # x
        + k_pad * n_pad * bytes_per          # weight
        + m_pad * n_pad * jnp.dtype(out_dtype).itemsize  # y
    )

    out2 = pl.pallas_call(
        _dense_kernel,
        out_shape=jax.ShapeDtypeStruct((m_pad, n_pad), out_dtype),
        grid_spec=pltpu.PrefetchScalarGridSpec(
            num_scalar_prefetch=0,
            grid=grid,
            in_specs=[
                pl.BlockSpec((tm, k_pad), lambda i: (i, 0)),
                # Constant block index -> weight fetched once, VMEM-resident.
                pl.BlockSpec((k_pad, n_pad), lambda i: (0, 0)),
            ],
            out_specs=pl.BlockSpec((tm, n_pad), lambda i: (i, 0)),
        ),
        compiler_params=pltpu.CompilerParams(
            # Row tiles are independent: shard across TensorCores (v7x megacore).
            dimension_semantics=("parallel",),
        ),
        cost_estimate=pl.CostEstimate(
            flops=flops, transcendentals=0, bytes_accessed=bytes_accessed
        ),
    )(x2, wt)

    out2 = out2[:m, :in_ch]
    return out2.reshape(*lead, in_ch)


if __name__ == "__main__":
    key = jax.random.PRNGKey(0)
    kx, kw = jax.random.split(key)

    B, S = 2, 8
    in_ch, out_ch = 64, 32  # weight shape (in_ch, out_ch); x last dim = out_ch

    x = jax.random.normal(kx, (B, S, out_ch), dtype=jnp.float32)
    weight = jax.random.normal(kw, (in_ch, out_ch), dtype=jnp.float32) * 0.02

    y = multi_head_dense(x, weight)
    y = jax.block_until_ready(y)

    # reference check (pure JAX): y = x @ weight.T
    y_ref = jnp.einsum("bsd,od->bso", x, weight)
    assert y.shape == (B, S, in_ch)
    assert jnp.allclose(y, y_ref, atol=1e-5, rtol=1e-5)

    print("KERNEL_OK")
</pallas_src>

<mosaic_0001>
module attributes {stable_mosaic.version = 11 : i64} {
  func.func @_dense_kernel(%arg0: i32, %arg1: memref<16x128xf32, #tpu.memory_space<vmem>>, %arg2: memref<128x128xf32, #tpu.memory_space<vmem>>, %arg3: memref<16x128xf32, #tpu.memory_space<vmem>>) attributes {dimension_semantics = [#tpu.dimension_semantics<parallel>], iteration_bounds = array<i64: 1>, scalar_prefetch = 0 : i64, scratch_operands = 0 : i64, tpu.core_type = #tpu.core_type<tc>, window_params = [{transform_indices = @transform_0, window_bounds = array<i64: 16, 128>}, {pipeline_mode = #tpu.pipeline_mode<synchronous>, transform_indices = @transform_1, window_bounds = array<i64: 128, 128>}, {transform_indices = @transform_2, window_bounds = array<i64: 16, 128>}]} {
    %c0 = arith.constant 0 : index
    %c0_0 = arith.constant 0 : index
    %0 = vector.load %arg1[%c0, %c0_0] : memref<16x128xf32, #tpu.memory_space<vmem>>, vector<16x128xf32>
    %c0_1 = arith.constant 0 : index
    %c0_2 = arith.constant 0 : index
    %1 = vector.load %arg2[%c0_1, %c0_2] : memref<128x128xf32, #tpu.memory_space<vmem>>, vector<128x128xf32>
    %cst = arith.constant dense<0.000000e+00> : vector<16x128xf32>
    %2 = tpu.matmul %0, %1, %cst {dimension_numbers = #tpu.dot_dimension_numbers<[1], [0], [0], [1], [0, 0, 1, 1], [], []>} : vector<16x128xf32>, vector<128x128xf32>, vector<16x128xf32> -> vector<16x128xf32>
    %c0_3 = arith.constant 0 : index
    %c0_4 = arith.constant 0 : index
    %3 = vector.load %arg3[%c0_3, %c0_4] : memref<16x128xf32, #tpu.memory_space<vmem>>, vector<16x128xf32>
    tpu.vector_store %arg3[%c0_3, %c0_4], %2 {strides = array<i32>} : memref<16x128xf32, #tpu.memory_space<vmem>>, vector<16x128xf32>,
    return
  }
  func.func @transform_0(%arg0: i32) -> (i32, i32) {
    %c0_i32 = arith.constant 0 : i32
    %c0_i32_0 = arith.constant 0 : i32
    return %arg0, %c0_i32 : i32, i32
  }
  func.func @transform_1(%arg0: i32) -> (i32, i32) {
    %c0_i32 = arith.constant 0 : i32
    %c0_i32_0 = arith.constant 0 : i32
    %c0_i32_1 = arith.constant 0 : i32
    return %c0_i32, %c0_i32_0 : i32, i32
  }
  func.func @transform_2(%arg0: i32) -> (i32, i32) {
    %c0_i32 = arith.constant 0 : i32
    %c0_i32_0 = arith.constant 0 : i32
    return %arg0, %c0_i32 : i32, i32
  }
}

</mosaic_0001>

<bundles_post_ra>
// kernel: tpu_custom_call.1
= control target key start
LH: loop header
LB: loop body
LE: loop exit
PB: predicated region body
PF: predicated region fallthrough
CT: control target
= control target key end

     0   :  { %7 = vsyncpa [#allocation3], 0  ;;  %s244_s0 = inlined_call_operand.hbm [shape: f32[16,128], index: 0, kind: input, shape index: {}]   ;;  %s245_s1 = inlined_call_operand.hbm [shape: f32[128,128], index: 1, kind: input, shape index: {}]   ;;  %s246_s2 = inlined_call_operand.hbm [shape: f32[16,128], index: 2, kind: output, shape index: {}]  }
   0x1   :  { %8 = vsyncpa [#allocation6], 0 }
   0x2   :  { %9 = vsyncpa [#allocation4], 0  ;;  %s14_s11 = sshll.u32 %s244_s0, 4  ;;  %s206_s12 = smov [#allocation2]   ;;  %s15_s11 = int_to_ptr.hbm [resolvable:$true] %s14_s11 }
   0x3   :  { %s16_s13 = sshll.u32 %s206_s12, 4  ;;  %s27_s16 = sshll.u32 %s245_s1, 4  ;;  %s17_s13 = int_to_ptr.vmem [resolvable:$true] %s16_s13  ;;  %s28_s16 = int_to_ptr.hbm [resolvable:$true] %s27_s16 }
   0x4   :  { %s207_s17 = smov 128   ;;  %s208_s18 = smov 8  }
   0x5   :  { %22 = dma.hbm_to_vmem [thread:$0]  %s15_s11, 256, %s17_s13, [#allocation3], %s207_s17, %s207_s17, %s208_s18  }
   0x6   :  { %s209_s19 = smov [#allocation5]  }
   0x7   :  { %s29_s20 = sshll.u32 %s209_s19, 4  ;;  %s30_s20 = int_to_ptr.vmem [resolvable:$true] %s29_s20 }
   0x8   :  { %35 = dma.hbm_to_vmem [thread:$0]  %s28_s16, 2048, %s30_s20, [#allocation6], %s207_s17, %s207_s17, %s208_s18  }
   0x9   :  { %200 = dma.done.wait [#allocation3], 256  }
   0xa   :  { %201 = vsyncadd [#allocation3], 4294967040 }
   0xb   :  { %202 = dma.done.wait [#allocation6], 2048  }
   0xc   :  { %203 = vsyncadd [#allocation6], 4294965248  ;;  %v61_v0 = vld [vmem:[#allocation5 + $0x78] sm:$0xff]  ;;  %v60_v1 = vld [vmem:[#allocation5 + $0x70] sm:$0xff]  ;;  %s210_s0 = smov [#allocation7]   ;;  %s93_s23 = sshll.u32 %s246_s2, 4  ;;  %s94_s23 = int_to_ptr.hbm [resolvable:$true] %s93_s23 }
   0xd   :  { %62 = vmatpush.msra.mxu0 %v61_v0  ;;  %107 = vmatpush.msra.mxu1 %v61_v0  ;;  %v59_v2 = vld [vmem:[#allocation5 + $0x68] sm:$0xff]  ;;  %v58_v3 = vld [vmem:[#allocation5 + $0x60] sm:$0xff]  ;;  %v57_v4 = vld [vmem:[#allocation5 + $0x58] sm:$0xff]  ;;  %s91_s1 = sshll.u32 %s210_s0, 4  ;;  %s92_s1 = int_to_ptr.vmem [resolvable:$true] %s91_s1 }
   0xe   :  { %v56_v5 = vld [vmem:[#allocation5 + $0x50] sm:$0xff]  ;;  %v55_v6 = vld [vmem:[#allocation5 + $0x48] sm:$0xff]  ;;  %v54_v7 = vld [vmem:[#allocation5 + $0x40] sm:$0xff] }
   0xf   :  { %63 = vmatpush.msra.mxu0 %v60_v1  ;;  %108 = vmatpush.msra.mxu1 %v60_v1  ;;  %v53_v8 = vld [vmem:[#allocation5 + $0x38] sm:$0xff]  ;;  %v52_v9 = vld [vmem:[#allocation5 + $0x30] sm:$0xff]  ;;  %v51_v10 = vld [vmem:[#allocation5 + $0x28] sm:$0xff] }
  0x10   :  { %v50_v11 = vld [vmem:[#allocation5 + $0x20] sm:$0xff]  ;;  %v49_v12 = vld [vmem:[#allocation5 + $0x18] sm:$0xff]  ;;  %v48_v13 = vld [vmem:[#allocation5 + $0x10] sm:$0xff] }
  0x11   :  { %64 = vmatpush.msra.mxu0 %v59_v2  ;;  %109 = vmatpush.msra.mxu1 %v59_v2  ;;  %v47_v14 = vld [vmem:[#allocation5 + $0x8] sm:$0xff]  ;;  %v46_v15 = vld [vmem:[#allocation5] sm:$0xff]  ;;  %v44_v16 = vld [vmem:[#allocation2] sm:$0xff] }
  0x12   :  { %v45_v17 = vld [vmem:[#allocation2 + $0x8] sm:$0xff] }
  0x13   :  { %65 = vmatpush.msra.mxu0 %v58_v3  ;;  %110 = vmatpush.msra.mxu1 %v58_v3 }
  0x15   :  { %66 = vmatpush.msra.mxu0 %v57_v4  ;;  %111 = vmatpush.msra.mxu1 %v57_v4 }
  0x17   :  { %67 = vmatpush.msra.mxu0 %v56_v5  ;;  %112 = vmatpush.msra.mxu1 %v56_v5 }
  0x19   :  { %68 = vmatpush.msra.mxu0 %v55_v6  ;;  %113 = vmatpush.msra.mxu1 %v55_v6 }
  0x1b   :  { %69 = vmatpush.msra.mxu0 %v54_v7  ;;  %114 = vmatpush.msra.mxu1 %v54_v7 }
  0x1d   :  { %70 = vmatpush.msra.mxu0 %v53_v8  ;;  %115 = vmatpush.msra.mxu1 %v53_v8 }
  0x1f   :  { %71 = vmatpush.msra.mxu0 %v52_v9  ;;  %116 = vmatpush.msra.mxu1 %v52_v9 }
  0x21   :  { %72 = vmatpush.msra.mxu0 %v51_v10  ;;  %117 = vmatpush.msra.mxu1 %v51_v10 }
  0x23   :  { %73 = vmatpush.msra.mxu0 %v50_v11  ;;  %118 = vmatpush.msra.mxu1 %v50_v11 }
  0x25   :  { %74 = vmatpush.msra.mxu0 %v49_v12  ;;  %119 = vmatpush.msra.mxu1 %v49_v12 }
  0x27   :  { %75 = vmatpush.msra.mxu0 %v48_v13  ;;  %120 = vmatpush.msra.mxu1 %v48_v13 }
  0x29   :  { %76 = vmatpush.msra.mxu0 %v47_v14  ;;  %121 = vmatpush.msra.mxu1 %v47_v14 }
  0x2b   :  { %77 = vmatpush.msra.mxu0 %v46_v15  ;;  %122 = vmatpush.msra.mxu1 %v46_v15 }
  0x2c   :  { %78 = vmatmul.f32.vlgmr.msra.gmra.mxu0 %v44_v16  ;;  %81 = vmatmul.f32.vlgmr.msra.gmra.mxu1 %v45_v17 }
  0xa9   :  { %v79_v18 = vpop.f32.mrf.mxu0  ;;  %v82_v19 = vpop.f32.mrf.mxu1 }
  0xaa   :  { %85 = vst [vmem:[#allocation7] sm:$0xff] %v79_v18 }
  0xab   :  { %86 = vst [vmem:[#allocation7 + $0x8] sm:$0xff] %v82_v19 }
  0xac   :  { %99 = dma.vmem_to_hbm [thread:$0]  %s92_s1, 256, %s94_s23, [#allocation4], %s207_s17, %s207_s17, %s208_s18  }
  0xad   :  { %204 = dma.done.wait [#allocation4], 256  }
  0xae   :  { %205 = vsyncadd [#allocation4], 4294967040 }
  0xaf   :  { %104 = vsyncpa [#allocation3], 1 }
  0xb0   :  { %105 = vsyncpa [#allocation6], 1 }
  0xb1   :  { %106 = vsyncpa [#allocation4], 1 }

</bundles_post_ra>
